<compile_context>
chip_gen: v7x
topology: tpu7x:2x2x1
jax: 0.10.0
libtpu: 0.0.40
codegen_flags: <defaults>
</compile_context>

<pallas_src>
import math
import functools

import jax
import jax.numpy as jnp
from jax import lax
from jax.experimental import pallas as pl
from jax.experimental.pallas import tpu as pltpu


def make_pe_table(d_model, max_len=30, dtype=jnp.float32):
    """(max_len, 1, d_model) sinusoidal table -- parameter setup, plain JAX."""
    position = jnp.arange(max_len, dtype=jnp.float32)[:, None]              # (L, 1)
    div_term = jnp.exp(jnp.arange(0, d_model, 2, dtype=jnp.float32)
                       * (-math.log(10000.0) / d_model))                    # (D/2,)
    pe = jnp.zeros((max_len, d_model), dtype=jnp.float32)
    pe = pe.at[:, 0::2].set(jnp.sin(position * div_term))
    pe = pe.at[:, 1::2].set(jnp.cos(position * div_term))
    return pe[:, None, :].astype(dtype)                                     # (L, 1, D)


def _hash_random_bits(seed_u32, base_index_u32, shape):
    """Portable per-element uint32 random bits (lowbias32-style integer hash).

    Used only when the TPU hardware PRNG is unavailable (e.g. CPU/interpret
    mode, where `pltpu.prng_seed` has no lowering rule)."""
    i0 = lax.broadcasted_iota(jnp.uint32, shape, 0)
    i1 = lax.broadcasted_iota(jnp.uint32, shape, 1)
    i2 = lax.broadcasted_iota(jnp.uint32, shape, 2)
    idx = (base_index_u32
           + i0 * jnp.uint32(shape[1] * shape[2])
           + i1 * jnp.uint32(shape[2])
           + i2)
    x = idx ^ (seed_u32 * jnp.uint32(0x9E3779B9))
    x = x ^ (x >> 16)
    x = x * jnp.uint32(0x7FEB352D)
    x = x ^ (x >> 15)
    x = x * jnp.uint32(0x846CA68B)
    x = x ^ (x >> 16)
    return x


def _pe_dropout_kernel(seed_ref, x_ref, pe_ref, o_ref, *, dropout_p, use_hw_prng):
    # x_ref: (TS, B, D), pe_ref: (TS, 1, D).  D maps to lanes, B to sublanes.
    y = x_ref[...].astype(jnp.float32) + pe_ref[...].astype(jnp.float32)

    if dropout_p > 0.0:
        shape = y.shape
        if use_hw_prng:
            # Per-tile seed so every grid step draws a distinct mask.
            pltpu.prng_seed(seed_ref[0] + pl.program_id(0))
            bits = pltpu.prng_random_bits(shape)
            if bits.dtype != jnp.uint32:
                bits = pltpu.bitcast(bits, jnp.uint32)
        else:
            # Portable fallback (non-TPU backend / interpreter).
            block_elems = shape[0] * shape[1] * shape[2]
            base = pl.program_id(0).astype(jnp.uint32) * jnp.uint32(block_elems)
            bits = _hash_random_bits(seed_ref[0].astype(jnp.uint32), base, shape)

        # Integer threshold compare on raw bits: keep with prob (1 - p).
        threshold = jnp.uint32(min(int(round(dropout_p * 4294967296.0)), 4294967295))
        keep = bits >= threshold
        scale = jnp.float32(1.0 / (1.0 - dropout_p))
        y = jnp.where(keep, y * scale, jnp.float32(0.0))

    o_ref[...] = y.astype(o_ref.dtype)


def positional_encoding_forward(x, pe_table, *, dropout_p=0.1, seed=0,
                                training=True, seq_tile=None, use_hw_prng=None):
    """x: (S, B, D); returns dropout(x + pe_table[:S]) (train) or x + pe (eval)."""
    S, B, D = x.shape
    pe = pe_table[:S]                                                       # (S, 1, D)
    p = float(dropout_p) if training else 0.0

    if use_hw_prng is None:
        # The TPU hardware PRNG only lowers on the TPU backend.
        use_hw_prng = jax.default_backend() == "tpu"

    # Largest seq tile whose double-buffered in/out blocks stay ~<= 4 MiB each
    # (well under the 32 MiB scoped-VMEM default; safe for v7x's 64 MiB VMEM).
    if seq_tile is None:
        bytes_per_row = B * D * x.dtype.itemsize
        seq_tile = max(1, (4 * 1024 * 1024) // max(bytes_per_row, 1))
    ts = min(int(seq_tile), S)
    grid = (pl.cdiv(S, ts),)

    seed_arr = jnp.asarray([seed], dtype=jnp.int32)
    kernel = functools.partial(_pe_dropout_kernel, dropout_p=p,
                               use_hw_prng=use_hw_prng)

    itemsize = x.dtype.itemsize
    cost = pl.CostEstimate(
        flops=S * B * D,
        transcendentals=0,
        bytes_accessed=2 * S * B * D * itemsize + S * D * pe.dtype.itemsize)

    return pl.pallas_call(
        kernel,
        out_shape=jax.ShapeDtypeStruct(x.shape, x.dtype),
        grid=grid,
        in_specs=[
            pl.BlockSpec(memory_space=pltpu.MemorySpace.SMEM),              # seed (1,)
            pl.BlockSpec((ts, B, D), lambda i: (i, 0, 0)),                  # x tile
            pl.BlockSpec((ts, 1, D), lambda i: (i, 0, 0)),                  # resident pe tile
        ],
        out_specs=pl.BlockSpec((ts, B, D), lambda i: (i, 0, 0)),
        compiler_params=pltpu.CompilerParams(
            dimension_semantics=("parallel",)),
        cost_estimate=cost,
    )(seed_arr, x, pe)


if __name__ == "__main__":
    # Small shapes consistent with the module: seq=8, batch=2, d_model=32.
    S, B, D = 8, 2, 32
    MAX_LEN = 30
    key = jax.random.PRNGKey(0)
    x = jax.random.normal(key, (S, B, D), dtype=jnp.float32)

    pe_table = make_pe_table(D, max_len=MAX_LEN)
    ref = x + pe_table[:S]

    # Eval mode (dropout off): kernel must equal x + pe exactly.
    out_eval = jax.block_until_ready(
        positional_encoding_forward(x, pe_table, dropout_p=0.0))
    assert out_eval.shape == (S, B, D)
    assert jnp.allclose(out_eval, ref, atol=1e-6), "eval-mode mismatch"

    # Training mode (dropout_p=0.1): every element must be either 0 (dropped)
    # or (x + pe) / (1 - p) (kept, inverse-scaled), matching nn.Dropout.
    p = 0.1
    out_train = jax.block_until_ready(
        positional_encoding_forward(x, pe_table, dropout_p=p, seed=0))
    assert out_train.shape == (S, B, D)
    scaled = ref / (1.0 - p)
    ok = jnp.all((jnp.abs(out_train) <= 1e-6) |
                 (jnp.abs(out_train - scaled) <= 1e-4))
    assert bool(ok), "train-mode dropout values inconsistent"

    print("KERNEL_OK")
</pallas_src>

<mosaic_0001>
module attributes {stable_mosaic.version = 11 : i64} {
  func.func @_pe_dropout_kernel(%arg0: i32, %arg1: memref<1xi32, #tpu.memory_space<smem>>, %arg2: memref<8x2x32xf32, #tpu.memory_space<vmem>>, %arg3: memref<8x1x32xf32, #tpu.memory_space<vmem>>, %arg4: memref<8x2x32xf32, #tpu.memory_space<vmem>>) attributes {dimension_semantics = [#tpu.dimension_semantics<parallel>], iteration_bounds = array<i64: 1>, scalar_prefetch = 0 : i64, scratch_operands = 0 : i64, tpu.core_type = #tpu.core_type<tc>, window_params = [{transform_indices = @transform_0, window_bounds = array<i64: 1>}, {transform_indices = @transform_1, window_bounds = array<i64: 8, 2, 32>}, {transform_indices = @transform_2, window_bounds = array<i64: 8, 1, 32>}, {transform_indices = @transform_3, window_bounds = array<i64: 8, 2, 32>}]} {
    %c0 = arith.constant 0 : index
    %c0_0 = arith.constant 0 : index
    %c0_1 = arith.constant 0 : index
    %0 = vector.load %arg2[%c0, %c0_0, %c0_1] : memref<8x2x32xf32, #tpu.memory_space<vmem>>, vector<8x2x32xf32>
    %c0_2 = arith.constant 0 : index
    %c0_3 = arith.constant 0 : index
    %c0_4 = arith.constant 0 : index
    %1 = vector.load %arg3[%c0_2, %c0_3, %c0_4] : memref<8x1x32xf32, #tpu.memory_space<vmem>>, vector<8x1x32xf32>
    %2 = vector.broadcast %1 : vector<8x1x32xf32> to vector<8x2x32xf32>
    %3 = arith.addf %0, %2 : vector<8x2x32xf32>
    %c0_5 = arith.constant 0 : index
    %c0_6 = arith.constant 0 : index
    %c0_7 = arith.constant 0 : index
    %4 = vector.load %arg4[%c0_5, %c0_6, %c0_7] : memref<8x2x32xf32, #tpu.memory_space<vmem>>, vector<8x2x32xf32>
    tpu.vector_store %arg4[%c0_5, %c0_6, %c0_7], %3 {strides = array<i32>} : memref<8x2x32xf32, #tpu.memory_space<vmem>>, vector<8x2x32xf32>,
    return
  }
  func.func @transform_0(%arg0: i32) -> i32 {
    %c0_i32 = arith.constant 0 : i32
    %c0_i32_0 = arith.constant 0 : i32
    return %c0_i32 : i32
  }
  func.func @transform_1(%arg0: i32) -> (i32, i32, i32) {
    %c0_i32 = arith.constant 0 : i32
    %c0_i32_0 = arith.constant 0 : i32
    %c0_i32_1 = arith.constant 0 : i32
    return %arg0, %c0_i32, %c0_i32_0 : i32, i32, i32
  }
  func.func @transform_2(%arg0: i32) -> (i32, i32, i32) {
    %c0_i32 = arith.constant 0 : i32
    %c0_i32_0 = arith.constant 0 : i32
    %c0_i32_1 = arith.constant 0 : i32
    return %arg0, %c0_i32, %c0_i32_0 : i32, i32, i32
  }
  func.func @transform_3(%arg0: i32) -> (i32, i32, i32) {
    %c0_i32 = arith.constant 0 : i32
    %c0_i32_0 = arith.constant 0 : i32
    %c0_i32_1 = arith.constant 0 : i32
    return %arg0, %c0_i32, %c0_i32_0 : i32, i32, i32
  }
}

</mosaic_0001>

<bundles_post_ra>
// kernel: tpu_custom_call.1
= control target key start
LH: loop header
LB: loop body
LE: loop exit
PB: predicated region body
PF: predicated region fallthrough
CT: control target
= control target key end

     0   :  { %9 = vsyncpa [#allocation4], 0  ;;  %s310_s0 = inlined_call_operand.<no memory space> [shape: s32[1], index: 0, kind: input, shape index: {}]   ;;  %s311_s1 = inlined_call_operand.hbm [shape: f32[8,2,32], index: 1, kind: input, shape index: {}]   ;;  %s312_s2 = inlined_call_operand.hbm [shape: f32[8,1,32], index: 2, kind: input, shape index: {}]   ;;  %s313_s3 = inlined_call_operand.hbm [shape: f32[8,2,32], index: 3, kind: output, shape index: {}]  }
   0x1   :  { %10 = vsyncpa [#allocation7], 0 }
   0x2   :  { %11 = vsyncpa [#allocation5], 0  ;;  %s230_s12 = smov [#allocation3]   ;;  %s158_s16 = scalar_lea.hbm %s311_s1, 256 }
   0x3   :  { %s19_s13 = sshll.u32 %s230_s12, 4  ;;  %p159_p0 = scmp.ne.s32.totalorder %s311_s1, %s158_s16  ;;  %s20_s13 = int_to_ptr.vmem [resolvable:$true] %s19_s13 }
   0x4   :  { %p162_p1 = scmp.lt.u32.totalorder %s158_s16, %s311_s1 }
   0x6   :  { %p164_p2 = pnand %p162_p1, %p159_p0 }
   0x8   :  { %167 = shalt.err (!%p164_p2)
}
   0x9   :  { %s168_s20 = scalar_lea.vmem %s20_s13, 256  ;;  %p173_p4 = scmp.lt.s32.totalorder %s20_s13, %s20_s13 }
   0xa   :  { %p169_p3 = scmp.ne.s32.totalorder %s20_s13, %s168_s20  ;;  %p174_p5 = scmp.lt.s32.totalorder %s168_s20, %s168_s20 }
   0xc   :  { %p175_p6 = por %p174_p5, %p173_p4 }
   0xe   :  { %p176_p7 = pnand %p175_p6, %p169_p3 }
  0x10   :  { %179 = shalt.err (!%p176_p7)
}
  0x11   :  { %s231_s21 = smov 32   ;;  %s232_s22 = smov 2  }
  0x12   :  { %25 = dma.hbm_to_vmem [thread:$0]  %s311_s1, 256, %s20_s13, [#allocation4], %s231_s21, %s231_s21, %s232_s22  }
  0x13   :  { %s233_s25 = smov [#allocation6]   ;;  %s180_s29 = scalar_lea.hbm %s312_s2, 128 }
  0x14   :  { %s31_s26 = sshll.u32 %s233_s25, 4  ;;  %p181_p8 = scmp.ne.s32.totalorder %s312_s2, %s180_s29  ;;  %s32_s26 = int_to_ptr.vmem [resolvable:$true] %s31_s26 }
  0x15   :  { %p184_p9 = scmp.lt.u32.totalorder %s180_s29, %s312_s2 }
  0x17   :  { %p186_p10 = pnand %p184_p9, %p181_p8 }
  0x19   :  { %189 = shalt.err (!%p186_p10)
}
  0x1a   :  { %s190_s7 = scalar_lea.vmem %s32_s26, 128  ;;  %p195_p12 = scmp.lt.s32.totalorder %s32_s26, %s32_s26 }
  0x1b   :  { %p191_p11 = scmp.ne.s32.totalorder %s32_s26, %s190_s7  ;;  %p196_p13 = scmp.lt.s32.totalorder %s190_s7, %s190_s7 }
  0x1d   :  { %p197_p0 = por %p196_p13, %p195_p12 }
  0x1f   :  { %p198_p1 = pnand %p197_p0, %p191_p11 }
  0x21   :  { %201 = shalt.err (!%p198_p1)
}
  0x22   :  { %s234_s1 = smov 16   ;;  %s235_s8 = smov 1  }
  0x23   :  { %37 = dma.hbm_to_vmem [thread:$0]  %s312_s2, 128, %s32_s26, [#allocation7], %s234_s1, %s234_s1, %s235_s8  }
  0x24   :  { %224 = dma.done.wait [#allocation4], 256  }
  0x25   :  { %225 = vsyncadd [#allocation4], 4294967040 }
  0x26   :  { %226 = dma.done.wait [#allocation7], 128  }
  0x27   :  { %227 = vsyncadd [#allocation7], 4294967168  ;;  %vm116_vm0 = vcmask 254976   ;;  %s236_s11 = smov [#allocation8]   ;;  %v44_v0 = vld [vmem:[#allocation3] sm:$0x3] }
  0x28   :  { %s284_s12 = sshll.u32 %s236_s11, 4  ;;  %v143_v1 = vld [vmem:[#allocation6] ss:$0 sm:$0xff]  ;;  %v45_v2 = vld [vmem:[#allocation3 + $0x2] sm:$0x3]  ;;  %s131_s12 = int_to_ptr.vmem [resolvable:$true] %s284_s12 }
  0x29   :  { %v108_v3 = vadd.f32 %v143_v1, %v44_v0  ;;  %v144_v4 = vld [vmem:[#allocation6 + $0x1] ss:$0 sm:$0xff]  ;;  %v46_v5 = vld [vmem:[#allocation3 + $0x4] sm:$0x3]  ;;  %v145_v6 = vld [vmem:[#allocation6 + $0x2] ss:$0 sm:$0xff]  ;;  %p207_p3 = scmp.lt.s32.totalorder %s131_s12, %s131_s12 }
  0x2a   :  { %v109_v7 = vadd.f32 %v144_v4, %v45_v2  ;;  %v110_v8 = vadd.f32 %v145_v6, %v46_v5  ;;  %v47_v9 = vld [vmem:[#allocation3 + $0x6] sm:$0x3]  ;;  %v146_v10 = vld [vmem:[#allocation6 + $0x3] ss:$0 sm:$0xff]  ;;  %v48_v11 = vld [vmem:[#allocation3 + $0x8] sm:$0x3] }
  0x2b   :  { %117 = vst.msk [vmem:[#allocation8] sm:$0x3] %vm116_vm0, %v108_v3  ;;  %v111_v12 = vadd.f32 %v146_v10, %v47_v9  ;;  %v147_v13 = vld [vmem:[#allocation6 + $0x4] ss:$0 sm:$0xff]  ;;  %v49_v14 = vld [vmem:[#allocation3 + $0xa] sm:$0x3] }
  0x2c   :  { %v148_v15 = vld [vmem:[#allocation6 + $0x5] ss:$0 sm:$0xff]  ;;  %118 = vst.msk [vmem:[#allocation8 + $0x2] sm:$0x3] %vm116_vm0, %v109_v7  ;;  %119 = vst.msk [vmem:[#allocation8 + $0x4] sm:$0x3] %vm116_vm0, %v110_v8  ;;  %v112_v16 = vadd.f32 %v147_v13, %v48_v11 }
  0x2d   :  { %v113_v17 = vadd.f32 %v148_v15, %v49_v14  ;;  %v50_v18 = vld [vmem:[#allocation3 + $0xc] sm:$0x3]  ;;  %v149_v19 = vld [vmem:[#allocation6 + $0x6] ss:$0 sm:$0xff]  ;;  %v51_v20 = vld [vmem:[#allocation3 + $0xe] sm:$0x3] }
  0x2e   :  { %120 = vst.msk [vmem:[#allocation8 + $0x6] sm:$0x3] %vm116_vm0, %v111_v12  ;;  %v114_v21 = vadd.f32 %v149_v19, %v50_v18  ;;  %v150_v22 = vld [vmem:[#allocation6 + $0x7] ss:$0 sm:$0xff]  ;;  %121 = vst.msk [vmem:[#allocation8 + $0x8] sm:$0x3] %vm116_vm0, %v112_v16 }
  0x2f   :  { %122 = vst.msk [vmem:[#allocation8 + $0xa] sm:$0x3] %vm116_vm0, %v113_v17  ;;  %v115_v23 = vadd.f32 %v150_v22, %v51_v20  ;;  %s202_s2 = scalar_lea.vmem %s131_s12, 256 }
  0x30   :  { %123 = vst.msk [vmem:[#allocation8 + $0xc] sm:$0x3] %vm116_vm0, %v114_v21  ;;  %p203_p2 = scmp.ne.s32.totalorder %s131_s12, %s202_s2  ;;  %p208_p4 = scmp.lt.s32.totalorder %s202_s2, %s202_s2 }
  0x31   :  { %124 = vst.msk [vmem:[#allocation8 + $0xe] sm:$0x3] %vm116_vm0, %v115_v23 }
  0x32   :  { %p209_p5 = por %p208_p4, %p207_p3 }
  0x34   :  { %p210_p6 = pnand %p209_p5, %p203_p2 }
  0x36   :  { %213 = shalt.err (!%p210_p6)
}
  0x37   :  { %s214_s15 = scalar_lea.hbm %s313_s3, 256 }
  0x38   :  { %p215_p7 = scmp.ne.s32.totalorder %s313_s3, %s214_s15  ;;  %p218_p8 = scmp.lt.u32.totalorder %s214_s15, %s313_s3 }
  0x3a   :  { %p220_p9 = pnand %p218_p8, %p215_p7 }
  0x3c   :  { %223 = shalt.err (!%p220_p9)
}
  0x3d   :  { %136 = dma.vmem_to_hbm [thread:$0]  %s131_s12, 256, %s313_s3, [#allocation5], %s231_s21, %s231_s21, %s232_s22  }
  0x3e   :  { %228 = dma.done.wait [#allocation5], 256  }
  0x3f   :  { %229 = vsyncadd [#allocation5], 4294967040 }
  0x40   :  { %140 = vsyncpa [#allocation4], 1 }
  0x41   :  { %141 = vsyncpa [#allocation7], 1 }
  0x42   :  { %142 = vsyncpa [#allocation5], 1 }

</bundles_post_ra>
